<compile_context>
chip_gen: v7x
topology: tpu7x:2x2x1
jax: 0.10.0
libtpu: 0.0.40
codegen_flags: <defaults>
</compile_context>

<pallas_src>
import numpy as np
import jax
import jax.numpy as jnp
from jax.experimental import pallas as pl
from jax.experimental.pallas import tpu as pltpu


def _round_up(n, m):
    return ((n + m - 1) // m) * m


def _gfp_kernel(x_ref, w2_ref, phase_ref, out_ref):
    # x_ref: (TB, 1) f32, w2_ref: (1, E) f32, phase_ref: (1, E) f32,
    # out_ref: (TB, E) out_dtype.
    x_log = jnp.log(x_ref[...])                           # (TB, 1)
    theta = x_log * w2_ref[...] + phase_ref[...]          # (TB, E) broadcast
    out_ref[...] = jnp.sin(theta).astype(out_ref.dtype)   # single lane-dense store


def gaussian_fourier_projection(x, W, *, out_dtype=jnp.bfloat16, block_rows=None,
                                use_pallas=None, small_batch_threshold=1024):
    """x: (B,) strictly-positive noise levels; W: (H,) fixed random weights.

    Returns (B, 2H) = concat([sin(2*pi*log(x)*W), cos(2*pi*log(x)*W)], -1).
    """
    B = x.shape[0]
    H = W.shape[0]
    E = 2 * H

    w = W.astype(jnp.float32)
    # Single-sin trick: cos(t) == sin(t + pi/2).
    w2 = (jnp.concatenate([w, w]) * (2.0 * np.pi)).reshape(1, E)
    phase = jnp.concatenate(
        [jnp.zeros((H,), jnp.float32), jnp.full((H,), np.pi / 2.0, jnp.float32)]
    ).reshape(1, E)
    x2d = x.astype(jnp.float32).reshape(B, 1)

    if use_pallas is None:
        use_pallas = B > small_batch_threshold
    if not use_pallas:
        # Small-batch fast path: pure launch overhead in Pallas; let XLA fuse
        # this into the first Dense of the time-embedding MLP instead.
        return jnp.sin(jnp.log(x2d) * w2 + phase).astype(out_dtype)

    out_bytes = jnp.dtype(out_dtype).itemsize
    if block_rows is None:
        # Per-row pipelined VMEM: 2 buffers x (E*out_bytes output row +
        # lane-padded (1 -> 128) f32 x row = 512 B). Budget 24 MiB leaves
        # headroom under the 32 MiB scoped limit (safe on v7x's 64 MiB VMEM).
        vmem_budget = 24 * 1024 * 1024
        per_row = 2 * (E * out_bytes + 128 * 4)
        block_rows = max(8, min(8192, (vmem_budget // per_row) // 8 * 8))
    tb = min(_round_up(B, 8), block_rows)
    grid = (pl.cdiv(B, tb),)

    return pl.pallas_call(
        _gfp_kernel,
        out_shape=jax.ShapeDtypeStruct((B, E), out_dtype),
        grid=grid,
        in_specs=[
            pl.BlockSpec((tb, 1), lambda i: (i, 0)),   # batch tile of x
            pl.BlockSpec((1, E), lambda i: (0, 0)),    # W2: resident
            pl.BlockSpec((1, E), lambda i: (0, 0)),    # phase: resident
        ],
        out_specs=pl.BlockSpec((tb, E), lambda i: (i, 0)),
        compiler_params=pltpu.CompilerParams(
            dimension_semantics=("parallel",),         # shard grid over v7x's 2 TCs
            vmem_limit_bytes=32 * 1024 * 1024,
        ),
    )(x2d, w2, phase)


if __name__ == "__main__":
    key = jax.random.PRNGKey(0)
    k_w, k_x = jax.random.split(key)

    embedding_size = 256
    scale = 1.0
    batch = 8

    # Deterministic "parameter" init (equivalent of torch.randn(E//2) * scale).
    W = jax.random.normal(k_w, (embedding_size // 2,), dtype=jnp.float32) * scale
    # Strictly positive noise levels (the module applies log(x)).
    x = jax.random.uniform(k_x, (batch,), dtype=jnp.float32, minval=0.01, maxval=1.0)

    # Plain-JAX reference mirroring the PyTorch forward.
    def ref_fn(xv):
        x_proj = jnp.log(xv)[:, None] * W[None, :] * 2.0 * np.pi
        return jnp.concatenate([jnp.sin(x_proj), jnp.cos(x_proj)], axis=-1)

    # 1) Force the Pallas path (f32 output) at the small test batch: tight check.
    out_pallas = jax.block_until_ready(
        gaussian_fourier_projection(x, W, out_dtype=jnp.float32, use_pallas=True))
    assert out_pallas.shape == (batch, embedding_size), out_pallas.shape
    np.testing.assert_allclose(np.asarray(out_pallas), np.asarray(ref_fn(x)),
                               atol=1e-5, rtol=1e-5)

    # 2) Boundary (masked) tile + default bf16 output: batch not a multiple of
    #    the tile -> grid of 2 with a partial last block, no host padding.
    batch2 = 12
    x2 = jax.random.uniform(jax.random.PRNGKey(1), (batch2,), dtype=jnp.float32,
                            minval=0.01, maxval=1.0)
    out_bf16 = jax.block_until_ready(
        gaussian_fourier_projection(x2, W, block_rows=8, use_pallas=True))
    assert out_bf16.shape == (batch2, embedding_size), out_bf16.shape
    assert out_bf16.dtype == jnp.bfloat16
    np.testing.assert_allclose(np.asarray(out_bf16, dtype=np.float32),
                               np.asarray(ref_fn(x2)), atol=1e-2, rtol=1e-2)

    # 3) Small-batch fast path (auto: skips Pallas, fuses in XLA).
    out_fast = jax.block_until_ready(
        gaussian_fourier_projection(x, W, out_dtype=jnp.float32))
    np.testing.assert_allclose(np.asarray(out_fast), np.asarray(ref_fn(x)),
                               atol=1e-5, rtol=1e-5)

    print("KERNEL_OK")
</pallas_src>

<mosaic_0001>
module attributes {stable_mosaic.version = 11 : i64} {
  func.func @_gfp_kernel(%arg0: i32, %arg1: memref<8x1xf32, #tpu.memory_space<vmem>>, %arg2: memref<1x256xf32, #tpu.memory_space<vmem>>, %arg3: memref<1x256xf32, #tpu.memory_space<vmem>>, %arg4: memref<8x256xf32, #tpu.memory_space<vmem>>) attributes {dimension_semantics = [#tpu.dimension_semantics<parallel>], iteration_bounds = array<i64: 1>, scalar_prefetch = 0 : i64, scratch_operands = 0 : i64, tpu.core_type = #tpu.core_type<tc>, window_params = [{transform_indices = @transform_0, window_bounds = array<i64: 8, 1>}, {pipeline_mode = #tpu.pipeline_mode<synchronous>, transform_indices = @transform_1, window_bounds = array<i64: 1, 256>}, {pipeline_mode = #tpu.pipeline_mode<synchronous>, transform_indices = @transform_2, window_bounds = array<i64: 1, 256>}, {transform_indices = @transform_3, window_bounds = array<i64: 8, 256>}]} {
    %c0 = arith.constant 0 : index
    %c0_0 = arith.constant 0 : index
    %0 = vector.load %arg1[%c0, %c0_0] : memref<8x1xf32, #tpu.memory_space<vmem>>, vector<8x1xf32>
    %1 = math.log %0 : vector<8x1xf32>
    %c0_1 = arith.constant 0 : index
    %c0_2 = arith.constant 0 : index
    %2 = vector.load %arg2[%c0_1, %c0_2] : memref<1x256xf32, #tpu.memory_space<vmem>>, vector<1x256xf32>
    %3 = vector.broadcast %1 : vector<8x1xf32> to vector<8x256xf32>
    %4 = vector.broadcast %2 : vector<1x256xf32> to vector<8x256xf32>
    %5 = arith.mulf %3, %4 : vector<8x256xf32>
    %c0_3 = arith.constant 0 : index
    %c0_4 = arith.constant 0 : index
    %6 = vector.load %arg3[%c0_3, %c0_4] : memref<1x256xf32, #tpu.memory_space<vmem>>, vector<1x256xf32>
    %7 = vector.broadcast %6 : vector<1x256xf32> to vector<8x256xf32>
    %8 = arith.addf %5, %7 : vector<8x256xf32>
    %9 = math.sin %8 : vector<8x256xf32>
    %c0_5 = arith.constant 0 : index
    %c0_6 = arith.constant 0 : index
    %10 = vector.load %arg4[%c0_5, %c0_6] : memref<8x256xf32, #tpu.memory_space<vmem>>, vector<8x256xf32>
    tpu.vector_store %arg4[%c0_5, %c0_6], %9 {strides = array<i32>} : memref<8x256xf32, #tpu.memory_space<vmem>>, vector<8x256xf32>,
    return
  }
  func.func @transform_0(%arg0: i32) -> (i32, i32) {
    %c0_i32 = arith.constant 0 : i32
    %c0_i32_0 = arith.constant 0 : i32
    return %arg0, %c0_i32 : i32, i32
  }
  func.func @transform_1(%arg0: i32) -> (i32, i32) {
    %c0_i32 = arith.constant 0 : i32
    %c0_i32_0 = arith.constant 0 : i32
    %c0_i32_1 = arith.constant 0 : i32
    return %c0_i32, %c0_i32_0 : i32, i32
  }
  func.func @transform_2(%arg0: i32) -> (i32, i32) {
    %c0_i32 = arith.constant 0 : i32
    %c0_i32_0 = arith.constant 0 : i32
    %c0_i32_1 = arith.constant 0 : i32
    return %c0_i32, %c0_i32_0 : i32, i32
  }
  func.func @transform_3(%arg0: i32) -> (i32, i32) {
    %c0_i32 = arith.constant 0 : i32
    %c0_i32_0 = arith.constant 0 : i32
    return %arg0, %c0_i32 : i32, i32
  }
}

</mosaic_0001>

<bundles_post_ra>
// kernel: tpu_custom_call.1
= control target key start
LH: loop header
LB: loop body
LE: loop exit
PB: predicated region body
PF: predicated region fallthrough
CT: control target
= control target key end

     0   :  { %v334_v1 = vmov 0   ;;  %s445_s0 = inlined_call_operand.vmem [shape: f32[8,1], index: 0, kind: input, shape index: {}]   ;;  %s446_s1 = inlined_call_operand.vmem [shape: f32[1,256], index: 1, kind: input, shape index: {}]   ;;  %s447_s2 = inlined_call_operand.vmem [shape: f32[1,256], index: 2, kind: input, shape index: {}]   ;;  %s448_s3 = inlined_call_operand.hbm [shape: f32[8,256], index: 3, kind: output, shape index: {}]  }
   0x1   :  { %v15_v0 = vld [vmem:[%s445_s0] sm:$0xff]  ;;  %299 = vset.pattern.permute.xlu0 %v334_v1 }
   0x2   :  { %300 = vlog2.f32 %v15_v0 }
   0x3   :  { %8 = vsyncpa [#allocation3], 0  ;;  %v25_v4 = vlaneseq  ;;  %v18_v8 = vld [vmem:[%s446_s1] sm:$0x3]  ;;  %v335_v39 = vmov 683565275  }
   0x4   :  { %v37_v9 = vld [vmem:[%s447_s2] sm:$0x3]  ;;  %v336_v43 = vmov 2475754826   ;;  %v337_v45 = vmov 2131351028  }
   0x5   :  { %v26_v5 = vshrl.u32 %v25_v4, 7  ;;  %v338_v47 = vmov 2102212464   ;;  %v339_v49 = vmov 920167782   ;;  %s341_s0 = smov [#allocation2]  }
   0x6   :  { %v340_v56 = vmov 1326507024   ;;  %s267_s1 = sshll.u32 %s341_s0, 4  ;;  %s268_s1 = int_to_ptr.vmem [resolvable:$true] %s267_s1 }
   0x7   :  { %v27_v6 = vsub.s32 0, %v26_v5  ;;  %v31_v7 = vsub.s32 1, %v26_v5  ;;  %s310_s2 = scalar_lea.vmem %s268_s1, 256  ;;  %p315_p1 = scmp.lt.s32.totalorder %s268_s1, %s268_s1 }
   0x8   :  { %p311_p0 = scmp.ne.s32.totalorder %s268_s1, %s310_s2  ;;  %p316_p2 = scmp.lt.s32.totalorder %s310_s2, %s310_s2 }
   0x9   :  { %v28_v10 = vrot.slane %v18_v8, %v27_v6  ;;  %v32_v11 = vrot.slane %v18_v8, %v31_v7  ;;  %v42_v12 = vrot.slane %v37_v9, %v27_v6  ;;  %v46_v13 = vrot.slane %v37_v9, %v31_v7 }
   0xa   :  { %p317_p3 = por %p316_p2, %p315_p1 }
   0xc   :  { %v301_v2 = vpop.eup %300  ;;  %p318_p4 = pnand %p317_p3, %p311_p0 }
   0xd   :  { %v17_v3 = vmul.f32 0.6931472, %v301_v2 }
   0xf   :  { %21 = vperm.xlu0 %299, %v17_v3  }
  0x8e   :  { %v22_v14 = vpop.permute.xlu0 %21 }
  0x8f   :  { %v35_v15 = vmul.f32 %v28_v10, %v22_v14  ;;  %v36_v16 = vmul.f32 %v32_v11, %v22_v14 }
  0x91   :  { %v371_v17 = vadd.f32 %v42_v12, %v35_v15  ;;  %v373_v18 = vadd.f32 %v46_v13, %v36_v16 }
  0x93   :  { %v51_v19 = vand.u32 2147483647, %v371_v17  ;;  %v54_v20 = vand.u32 2139095040, %v371_v17  ;;  %v158_v21 = vand.u32 2139095040, %v373_v18  ;;  %v155_v24 = vand.u32 2147483647, %v373_v18 }
  0x94   :  { %vm53_vm14 = vcmp.lt.s32.totalorder %v371_v17, 0 }
  0x95   :  { %v55_v22 = vshrl.u32 %v54_v20, 23  ;;  %v58_v23 = vand.u32 8388607, %v51_v19  ;;  %v159_v25 = vshrl.u32 %v158_v21, 23  ;;  %v383_v30 = vand.u32 8388607, %v155_v24 }
  0x96   :  { %vm52_vm15 = vcmp.le.f32.partialorder %v51_v19, 0.7853982 }
  0x97   :  { %v275_v26 = vadd.s32 4294967169, %v55_v22  ;;  %v279_v27 = vadd.s32 4294967169, %v159_v25  ;;  %v59_v29 = vor.u32 8388608, %v58_v23  ;;  %v163_v37 = vor.u32 8388608, %v383_v30 }
  0x99   :  { %v61_v28 = vadd.s32 1, %v275_v26  ;;  %v165_v31 = vadd.s32 1, %v279_v27  ;;  %v385_v36 = vshll.u32 %v59_v29, 8 }
  0x9b   :  { %vm62_vm0 = vcmp.gt.s32.totalorder %v61_v28, 0  ;;  %vm166_vm1 = vcmp.gt.s32.totalorder %v165_v31, 0 }
  0x9c   :  { %v63_v32 = vsel %vm62_vm0, %v61_v28, 0  ;;  %v167_v35 = vsel %vm166_vm1, %v165_v31, 0  ;;  %v203_v31 = vshll.u32 %v163_v37, 8  ;;  %vm157_vm0 = vcmp.lt.s32.totalorder %v373_v18, 0 }
  0x9d   :  { %v64_v33 = vshrl.u32 %v63_v32, 5  ;;  %v65_v34 = vand.u32 31, %v63_v32  ;;  %v388_v41 = vshrl.u32 %v167_v35, 5  ;;  %v169_v42 = vand.u32 31, %v167_v35 }
  0x9e   :  { %vm156_vm1 = vcmp.le.f32.partialorder %v155_v24, 0.7853982 }
  0x9f   :  { %v66_v38 = vsub.s32 32, %v65_v34  ;;  %v68_v40 = vshll.u32 %v335_v39, %v65_v34  ;;  %v71_v44 = vshll.u32 %v336_v43, %v65_v34  ;;  %v74_v46 = vshll.u32 %v337_v45, %v65_v34 }
  0xa0   :  { %v77_v48 = vshll.u32 %v338_v47, %v65_v34  ;;  %v80_v50 = vshll.u32 %v339_v49, %v65_v34  ;;  %vm83_vm2 = vcmp.lt.s32.totalorder %v64_v33, 1  ;;  %vm84_vm3 = vcmp.lt.s32.totalorder %v64_v33, 2 }
  0xa1   :  { %v69_v51 = vshrl.u32 %v336_v43, %v66_v38  ;;  %v72_v52 = vshrl.u32 %v337_v45, %v66_v38  ;;  %v75_v53 = vshrl.u32 %v338_v47, %v66_v38  ;;  %v67_v54 = vshrl.u32 %v335_v39, %v66_v38 }
  0xa2   :  { %v78_v55 = vshrl.u32 %v339_v49, %v66_v38  ;;  %v81_v57 = vshrl.u32 %v340_v56, %v66_v38  ;;  %v170_v61 = vsub.s32 32, %v169_v42  ;;  %vm85_vm4 = vcmp.lt.s32.totalorder %v64_v33, 3 }
  0xa3   :  { %v70_v58 = vor.u32 %v69_v51, %v68_v40  ;;  %v73_v59 = vor.u32 %v72_v52, %v71_v44  ;;  %v76_v60 = vor.u32 %v75_v53, %v74_v46  ;;  %vm86_vm5 = vcmp.lt.s32.totalorder %v64_v33, 4 }
  0xa4   :  { %v79_v62 = vor.u32 %v78_v55, %v77_v48  ;;  %v82_v63 = vor.u32 %v81_v57, %v80_v50  ;;  %v172_v7 = vshll.u32 %v335_v39, %v169_v42  ;;  %v173_v10 = vshrl.u32 %v336_v43, %v170_v61 }
  0xa5   :  { %v87_v0 = vsel %vm83_vm2, %v67_v54, %v70_v58  ;;  %v88_v1 = vsel %vm86_vm5, %v76_v60, 2102212464  ;;  %v91_v2 = vsel %vm83_vm2, %v70_v58, %v73_v59  ;;  %v95_v3 = vsel %vm83_vm2, %v73_v59, %v76_v60 }
  0xa6   :  { %v89_v4 = vsel %vm85_vm4, %v73_v59, %v88_v1  ;;  %v92_v5 = vsel %vm86_vm5, %v79_v62, 920167782  ;;  %v96_v6 = vsel %vm86_vm5, %v82_v63, 1326507024  ;;  %v175_v11 = vshll.u32 %v336_v43, %v169_v42 }
  0xa7   :  { %v93_v8 = vsel %vm85_vm4, %v76_v60, %v92_v5  ;;  %v97_v9 = vsel %vm85_vm4, %v79_v62, %v96_v6  ;;  %v90_v12 = vsel %vm84_vm3, %v87_v0, %v89_v4  ;;  %v176_v15 = vshrl.u32 %v337_v45, %v170_v61 }
  0xa8   :  { %v94_v13 = vsel %vm84_vm3, %v91_v2, %v93_v8  ;;  %v98_v14 = vsel %vm84_vm3, %v95_v3, %v97_v9  ;;  %v174_v23 = vor.u32 %v173_v10, %v172_v7  ;;  %v178_v26 = vshll.u32 %v337_v45, %v169_v42 }
  0xa9   :  { %v397_v16 = vmul.u32.u64.low %v385_v36, %v98_v14  ;;  %v398_v20 = vmul.u32.u64.high %v385_v36, %v98_v14, %v397_v16  ;;  %v401_v21 = vmul.u32.u64.low %v385_v36, %v94_v13  ;;  %v402_v22 = vmul.u32.u64.high %v385_v36, %v94_v13, %v401_v21 }
  0xaa   :  { %v177_v25 = vor.u32 %v176_v15, %v175_v11  ;;  %v179_v27 = vshrl.u32 %v338_v47, %v170_v61  ;;  %v181_v28 = vshll.u32 %v338_v47, %v169_v42  ;;  %v182_v29 = vshrl.u32 %v339_v49, %v170_v61 }
  0xab   :  { %v185_v30 = vshrl.u32 %v340_v56, %v170_v61  ;;  %v106_v32 = vmul.u32 %v385_v36, %v90_v12  ;;  %v171_v33 = vshrl.u32 %v335_v39, %v170_v61  ;;  %v184_v35 = vshll.u32 %v339_v49, %v169_v42 }
  0xac   :  { %v180_v34 = vor.u32 %v179_v27, %v178_v26  ;;  %vm108_vm6 = vc.u32 %v398_v20, %v401_v21  ;;  %v109_v38 = vadd.s32 1, %v402_v22  ;;  %v183_v40 = vor.u32 %v182_v29, %v181_v28 }
  0xad   :  { %vm187_vm7 = vcmp.lt.s32.totalorder %v388_v41, 1  ;;  %v186_v43 = vor.u32 %v185_v30, %v184_v35  ;;  %vm189_vm8 = vcmp.lt.s32.totalorder %v388_v41, 3  ;;  %vm190_vm9 = vcmp.lt.s32.totalorder %v388_v41, 4 }
  0xae   :  { %v195_v44 = vsel %vm187_vm7, %v174_v23, %v177_v25  ;;  %v110_v37 = vsel %vm108_vm6, %v109_v38, %v402_v22  ;;  %v192_v45 = vsel %vm190_vm9, %v180_v34, 2102212464  ;;  %v196_v36 = vsel %vm190_vm9, %v183_v40, 920167782 }
  0xaf   :  { %v199_v39 = vsel %vm187_vm7, %v177_v25, %v180_v34  ;;  %v111_v46 = vadd.s32 %v110_v37, %v106_v32  ;;  %vm188_vm10 = vcmp.lt.s32.totalorder %v388_v41, 2  ;;  %v197_v42 = vsel %vm189_vm8, %v180_v34, %v196_v36 }
  0xb0   :  { %v200_v47 = vsel %vm190_vm9, %v186_v43, 1326507024  ;;  %v191_v48 = vsel %vm187_vm7, %v171_v33, %v174_v23  ;;  %v193_v49 = vsel %vm189_vm8, %v177_v25, %v192_v45  ;;  %v198_v50 = vsel %vm188_vm10, %v195_v44, %v197_v42 }
  0xb1   :  { %v201_v51 = vsel %vm189_vm8, %v183_v40, %v200_v47  ;;  %v112_v52 = vadd.s32 536870912, %v111_v46  ;;  %v412_v54 = vmul.u32.u64.low %v203_v31, %v198_v50  ;;  %v413_v55 = vmul.u32.u64.high %v203_v31, %v198_v50, %v412_v54 }
  0xb2   :  { %v202_v53 = vsel %vm188_vm10, %v199_v39, %v201_v51  ;;  %v194_v59 = vsel %vm188_vm10, %v191_v48, %v193_v49  ;;  %v107_v11 = vadd.s32 %v401_v21, %v398_v20  ;;  %vm143_vm5 = vweird.f32 %v371_v17 }
  0xb3   :  { %v415_v56 = vmul.u32.u64.low %v203_v31, %v202_v53  ;;  %v416_v57 = vmul.u32.u64.high %v203_v31, %v202_v53, %v415_v56  ;;  %v113_v58 = vshrl.u32 %v112_v52, 30  ;;  %v213_v61 = vadd.s32 1, %v413_v55 }
  0xb4   :  { %v210_v41 = vmul.u32 %v203_v31, %v194_v59  ;;  %vm247_vm9 = vweird.f32 %v373_v18 }
  0xb5   :  { %v114_v60 = vshll.u32 %v113_v58, 30  ;;  %vm212_vm11 = vc.u32 %v416_v57, %v412_v54  ;;  %v211_v32 = vadd.s32 %v412_v54, %v416_v57  ;;  %v137_v21 = vsub.s32 4, %v113_v58 }
  0xb6   :  { %v214_v63 = vsel %vm212_vm11, %v213_v61, %v413_v55 }
  0xb7   :  { %v115_v62 = vsub.s32 %v111_v46, %v114_v60  ;;  %v215_v0 = vadd.s32 %v214_v63, %v210_v41  ;;  %v138_v36 = vsel %vm53_vm14, %v137_v21, %v113_v58 }
  0xb8   :  { %v140_v48 = vsel %vm52_vm15, 0, %v138_v36 }
  0xb9   :  { %v117_v1 = vsub.s32 0, %v115_v62  ;;  %v216_v2 = vadd.s32 536870912, %v215_v0  ;;  %v144_v51 = vadd.s32 3, %v140_v48 }
  0xbb   :  { %v276_v3 = vmin.u32 %v117_v1, %v115_v62  ;;  %v217_v4 = vshrl.u32 %v216_v2, 30  ;;  %v145_v54 = vand.u32 3, %v144_v51 }
  0xbd   :  { %v119_v5 = vclz %v276_v3  ;;  %v218_v6 = vshll.u32 %v217_v4, 30  ;;  %v241_v50 = vsub.s32 4, %v217_v4  ;;  %vm150_vm2 = vcmp.eq.s32.totalorder %v145_v54, 2 }
  0xbe   :  { %vm147_vm3 = vcmp.eq.s32.totalorder %v145_v54, 0  ;;  %vm146_vm4 = vcmp.lt.s32.totalorder %v145_v54, 2 }
  0xbf   :  { %v277_v7 = vadd.s32 4294967294, %v119_v5  ;;  %v219_v8 = vsub.s32 %v215_v0, %v218_v6  ;;  %v242_v19 = vsel %vm157_vm0, %v241_v50, %v217_v4 }
  0xc0   :  { %v244_v57 = vsel %vm156_vm1, 0, %v242_v19 }
  0xc1   :  { %vm278_vm12 = vcmp.lt.s32.totalorder %v277_v7, 0  ;;  %v221_v10 = vsub.s32 0, %v219_v8  ;;  %v248_v41 = vadd.s32 3, %v244_v57 }
  0xc2   :  { %v122_v9 = vsel %vm278_vm12, 0, %v277_v7 }
  0xc3   :  { %v123_v12 = vsub.s32 32, %v122_v9  ;;  %v127_v13 = vsub.s32 4294967266, %v122_v9  ;;  %v280_v14 = vmin.u32 %v221_v10, %v219_v8  ;;  %v124_v15 = vshll.u32 %v115_v62, %v122_v9 }
  0xc4   :  { %v249_v0 = vand.u32 3, %v248_v41 }
  0xc5   :  { %v125_v16 = vshrl.u32 %v107_v11, %v123_v12  ;;  %v128_v22 = vadd.s32 127, %v127_v13  ;;  %v223_v23 = vclz %v280_v14 }
  0xc6   :  { %vm254_vm6 = vcmp.eq.s32.totalorder %v249_v0, 2  ;;  %vm251_vm7 = vcmp.eq.s32.totalorder %v249_v0, 0  ;;  %vm250_vm8 = vcmp.lt.s32.totalorder %v249_v0, 2 }
  0xc7   :  { %v126_v25 = vor.u32 %v125_v16, %v124_v15  ;;  %v129_v26 = vshll.u32 %v128_v22, 23  ;;  %v281_v27 = vadd.s32 4294967294, %v223_v23 }
  0xc9   :  { %v130_v28 = vor.u32 4788187, %v129_v26  ;;  %vm282_vm13 = vcmp.lt.s32.totalorder %v281_v27, 0  ;;  %v133_v30 = vcvt.s32.f32 %v126_v25 }
  0xca   :  { %v226_v31 = vsel %vm282_vm13, 0, %v281_v27 }
  0xcb   :  { %v131_v29 = vand.u32 2147483647, %v130_v28  ;;  %v227_v33 = vsub.s32 32, %v226_v31  ;;  %v231_v34 = vsub.s32 4294967266, %v226_v31  ;;  %v228_v35 = vshll.u32 %v219_v8, %v226_v31 }
  0xcd   :  { %v134_v20 = vmul.f32 %v133_v30, %v131_v29  ;;  %v229_v38 = vshrl.u32 %v211_v32, %v227_v33  ;;  %v232_v40 = vadd.s32 127, %v231_v34 }
  0xcf   :  { %v135_v43 = vxor.u32 2147483648, %v134_v20  ;;  %v230_v44 = vor.u32 %v229_v38, %v228_v35  ;;  %v233_v37 = vshll.u32 %v232_v40, 23 }
  0xd1   :  { %v136_v45 = vsel %vm53_vm14, %v135_v43, %v134_v20  ;;  %v234_v39 = vor.u32 4788187, %v233_v37  ;;  %v237_v47 = vcvt.s32.f32 %v230_v44 }
  0xd2   :  { %v139_v46 = vsel %vm52_vm15, %v371_v17, %v136_v45 }
  0xd3   :  { %302 = vcosq.f32 %v139_v46  ;;  %v235_v42 = vand.u32 2147483647, %v234_v39 }
  0xd4   :  { %304 = vsinq.f32 %v139_v46 }
  0xd5   :  { %v238_v49 = vmul.f32 %v237_v47, %v235_v42 }
  0xd7   :  { %v239_v52 = vxor.u32 2147483648, %v238_v49 }
  0xd9   :  { %v240_v53 = vsel %vm157_vm0, %v239_v52, %v238_v49 }
  0xda   :  { %v243_v55 = vsel %vm156_vm1, %v373_v18, %v240_v53 }
  0xdb   :  { %306 = vcosq.f32 %v243_v55 }
  0xdc   :  { %308 = vsinq.f32 %v243_v55 }
  0xdd   :  { %v303_v56 = vpop.eup %302 }
  0xde   :  { %v305_v58 = vpop.eup %304  ;;  %v151_v59 = vxor.u32 2147483648, %v303_v56 }
  0xdf   :  { %v148_v60 = vxor.u32 2147483648, %v305_v58 }
  0xe0   :  { %v152_v61 = vsel %vm150_vm2, %v151_v59, %v305_v58 }
  0xe1   :  { %v149_v62 = vsel %vm147_vm3, %v303_v56, %v148_v60 }
  0xe2   :  { %v153_v24 = vsel %vm146_vm4, %v149_v62, %v152_v61 }
  0xe3   :  { %v154_v63 = vsel %vm143_vm5, nan, %v153_v24 }
  0xe4   :  { %259 = vst [vmem:[#allocation2] sm:$0xff] %v154_v63 }
  0xe5   :  { %v307_v1 = vpop.eup %306 }
  0xe6   :  { %v309_v2 = vpop.eup %308  ;;  %v255_v3 = vxor.u32 2147483648, %v307_v1 }
  0xe7   :  { %v252_v4 = vxor.u32 2147483648, %v309_v2 }
  0xe8   :  { %v256_v5 = vsel %vm254_vm6, %v255_v3, %v309_v2 }
  0xe9   :  { %v253_v6 = vsel %vm251_vm7, %v307_v1, %v252_v4 }
  0xea   :  { %v257_v7 = vsel %vm250_vm8, %v253_v6, %v256_v5 }
  0xeb   :  { %v258_v17 = vsel %vm247_vm9, nan, %v257_v7 }
  0xec   :  { %260 = vst [vmem:[#allocation2 + $0x8] sm:$0xff] %v258_v17 }
  0xed   :  { %321 = shalt.err (!%p318_p4)
}
  0xee   :  { %s322_s20 = scalar_lea.hbm %s448_s3, 256 }
  0xef   :  { %p323_p5 = scmp.ne.s32.totalorder %s448_s3, %s322_s20  ;;  %p326_p6 = scmp.lt.u32.totalorder %s322_s20, %s448_s3 }
  0xf1   :  { %p328_p7 = pnand %p326_p6, %p323_p5 }
  0xf3   :  { %331 = shalt.err (!%p328_p7)
}
  0xf4   :  { %270 = dma.vmem_to_hbm [thread:$0]  %s268_s1, 256, %s448_s3, [#allocation3]  }
  0xf5   :  { %332 = dma.done.wait [#allocation3], 256  }
  0xf6   :  { %333 = vsyncadd [#allocation3], 4294967040 }
  0xf7   :  { %274 = vsyncpa [#allocation3], 1 }

</bundles_post_ra>
